<compile_context>
chip_gen: v6e
topology: v6e:2x2x1
jax: 0.10.0
libtpu: 0.0.40
codegen_flags: <defaults>
</compile_context>

<pallas_src>
import functools

import jax
import jax.numpy as jnp
from jax.experimental import pallas as pl
from jax.experimental.pallas import tpu as pltpu

WIDTH = 20
DEPTH = 6


def _round_up(x, m):
    return ((x + m - 1) // m) * m


def _mlp_kernel(last_layer, out_pad, matmul_dtype, x_ref, w_ref, b_ref, out_ref):
    # x_ref  : (F_PAD, TB)            activations, batch on the lane axis
    # w_ref  : (DEPTH, F_PAD, F_PAD)  W_l^T, zero-padded, resident in VMEM
    # b_ref  : (DEPTH, F_PAD, 1)      biases, zero-padded, resident in VMEM
    # out_ref: (OUT_PAD, TB)
    h = x_ref[...]
    for layer in range(DEPTH):
        w = w_ref[layer].astype(matmul_dtype)
        b = b_ref[layer]                       # (F_PAD, 1) -> lane broadcast
        h = jnp.dot(w, h.astype(matmul_dtype),
                    preferred_element_type=jnp.float32) + b
        if layer < DEPTH - 1:
            h = jnp.tanh(h)
    h = h[:out_pad, :]                         # static, 8-aligned sublane slice
    if last_layer:
        h = jax.nn.sigmoid(h)
    out_ref[...] = h.astype(out_ref.dtype)


def init_mlp_params(key, input_dim, output_dim):
    """Deterministic parameter init (stand-in for init_weights_biases)."""
    dims = [input_dim] + [WIDTH] * (DEPTH - 1) + [output_dim]
    params = []
    for i in range(DEPTH):
        key, kw, kb = jax.random.split(key, 3)
        fan_in = dims[i]
        scale = 1.0 / jnp.sqrt(jnp.float32(fan_in))
        w = jax.random.uniform(kw, (dims[i], dims[i + 1]), jnp.float32,
                               minval=-scale, maxval=scale)
        b = jax.random.uniform(kb, (1, dims[i + 1]), jnp.float32,
                               minval=-scale, maxval=scale)
        params.append((w, b))
    return params


def mlp_forward(x, params, last_layer=False, *, block_batch=512,
                matmul_dtype=jnp.float32):
    batch, input_dim = x.shape
    output_dim = params[-1][0].shape[1]

    f_pad = _round_up(max(input_dim, WIDTH, output_dim), 8)
    out_pad = _round_up(output_dim, 8)

    # --- pack the 12 tiny parameter arrays into two padded slabs (host side) --
    w_slab = jnp.zeros((DEPTH, f_pad, f_pad), jnp.float32)
    b_slab = jnp.zeros((DEPTH, f_pad, 1), jnp.float32)
    for l, (w, b) in enumerate(params):
        in_d, out_d = w.shape
        w_slab = w_slab.at[l, :out_d, :in_d].set(w.T)            # (out, in)
        b_slab = b_slab.at[l, :out_d, 0].set(b.reshape(-1))

    # --- lane-dense input layout: features on sublanes, batch on lanes -------
    tb = min(block_batch, _round_up(batch, 128))   # batch tile (lane width)
    batch_pad = _round_up(batch, tb)
    x_t = jnp.zeros((f_pad, batch_pad), jnp.float32)
    x_t = x_t.at[:input_dim, :batch].set(x.T.astype(jnp.float32))

    kernel = functools.partial(_mlp_kernel, last_layer, out_pad, matmul_dtype)

    out_t = pl.pallas_call(
        kernel,
        out_shape=jax.ShapeDtypeStruct((out_pad, batch_pad), x.dtype),
        grid=(batch_pad // tb,),
        in_specs=[
            pl.BlockSpec((f_pad, tb), lambda i: (0, i)),              # x tile
            pl.BlockSpec((DEPTH, f_pad, f_pad), lambda i: (0, 0, 0)),  # weights
            pl.BlockSpec((DEPTH, f_pad, 1), lambda i: (0, 0, 0)),      # biases
        ],
        out_specs=pl.BlockSpec((out_pad, tb), lambda i: (0, i)),
        compiler_params=pltpu.CompilerParams(
            dimension_semantics=("parallel",)),
    )(x_t, w_slab, b_slab)

    # layout plumbing back to the torch.nn.Linear convention: (batch, out_dim)
    return out_t[:output_dim, :batch].T


def mlp_reference(x, params, last_layer=False):
    h = x
    for i, (w, b) in enumerate(params):
        h = h @ w + b
        if i < DEPTH - 1:
            h = jnp.tanh(h)
    if last_layer:
        h = jax.nn.sigmoid(h)
    return h


if __name__ == "__main__":
    key = jax.random.PRNGKey(0)
    k_x, k_p = jax.random.split(key)

    batch, input_dim, output_dim = 8, 4, 3
    x = jax.random.normal(k_x, (batch, input_dim), dtype=jnp.float32)
    params = init_mlp_params(k_p, input_dim, output_dim)

    out = mlp_forward(x, params, last_layer=True)
    out = jax.block_until_ready(out)

    ref = mlp_reference(x, params, last_layer=True)
    assert out.shape == (batch, output_dim)
    assert jnp.allclose(out, ref, atol=1e-5, rtol=1e-5), \
        float(jnp.max(jnp.abs(out - ref)))

    print("KERNEL_OK")
</pallas_src>

<mosaic_0001>
module attributes {stable_mosaic.version = 11 : i64} {
  func.func @_mlp_kernel(%arg0: i32, %arg1: memref<24x128xf32, #tpu.memory_space<vmem>>, %arg2: memref<6x24x24xf32, #tpu.memory_space<vmem>>, %arg3: memref<6x24x1xf32, #tpu.memory_space<vmem>>, %arg4: memref<8x128xf32, #tpu.memory_space<vmem>>) attributes {dimension_semantics = [#tpu.dimension_semantics<parallel>], iteration_bounds = array<i64: 1>, scalar_prefetch = 0 : i64, scratch_operands = 0 : i64, tpu.core_type = #tpu.core_type<tc>, window_params = [{transform_indices = @transform_0, window_bounds = array<i64: 24, 128>}, {pipeline_mode = #tpu.pipeline_mode<synchronous>, transform_indices = @transform_1, window_bounds = array<i64: 6, 24, 24>}, {pipeline_mode = #tpu.pipeline_mode<synchronous>, transform_indices = @transform_2, window_bounds = array<i64: 6, 24, 1>}, {transform_indices = @transform_3, window_bounds = array<i64: 8, 128>}]} {
    %c0 = arith.constant 0 : index
    %c0_0 = arith.constant 0 : index
    %0 = vector.load %arg1[%c0, %c0_0] : memref<24x128xf32, #tpu.memory_space<vmem>>, vector<24x128xf32>
    %c0_1 = arith.constant 0 : index
    %c0_2 = arith.constant 0 : index
    %c0_3 = arith.constant 0 : index
    %1 = vector.load %arg2[%c0_1, %c0_2, %c0_3] : memref<6x24x24xf32, #tpu.memory_space<vmem>>, vector<1x24x24xf32>
    %2 = vector.shape_cast %1 : vector<1x24x24xf32> to vector<24x24xf32>
    %c0_4 = arith.constant 0 : index
    %c0_5 = arith.constant 0 : index
    %c0_6 = arith.constant 0 : index
    %3 = vector.load %arg3[%c0_4, %c0_5, %c0_6] : memref<6x24x1xf32, #tpu.memory_space<vmem>>, vector<1x24x1xf32>
    %4 = vector.shape_cast %3 : vector<1x24x1xf32> to vector<24x1xf32>
    %cst = arith.constant dense<0.000000e+00> : vector<24x128xf32>
    %5 = tpu.matmul %2, %0, %cst {dimension_numbers = #tpu.dot_dimension_numbers<[1], [0], [0], [1], [0, 0, 1, 1], [], []>} : vector<24x24xf32>, vector<24x128xf32>, vector<24x128xf32> -> vector<24x128xf32>
    %6 = vector.broadcast %4 : vector<24x1xf32> to vector<24x128xf32>
    %7 = arith.addf %5, %6 : vector<24x128xf32>
    %8 = math.tanh %7 : vector<24x128xf32>
    %c1 = arith.constant 1 : index
    %c0_7 = arith.constant 0 : index
    %c0_8 = arith.constant 0 : index
    %9 = vector.load %arg2[%c1, %c0_7, %c0_8] : memref<6x24x24xf32, #tpu.memory_space<vmem>>, vector<1x24x24xf32>
    %10 = vector.shape_cast %9 : vector<1x24x24xf32> to vector<24x24xf32>
    %c1_9 = arith.constant 1 : index
    %c0_10 = arith.constant 0 : index
    %c0_11 = arith.constant 0 : index
    %11 = vector.load %arg3[%c1_9, %c0_10, %c0_11] : memref<6x24x1xf32, #tpu.memory_space<vmem>>, vector<1x24x1xf32>
    %12 = vector.shape_cast %11 : vector<1x24x1xf32> to vector<24x1xf32>
    %cst_12 = arith.constant dense<0.000000e+00> : vector<24x128xf32>
    %13 = tpu.matmul %10, %8, %cst_12 {dimension_numbers = #tpu.dot_dimension_numbers<[1], [0], [0], [1], [0, 0, 1, 1], [], []>} : vector<24x24xf32>, vector<24x128xf32>, vector<24x128xf32> -> vector<24x128xf32>
    %14 = vector.broadcast %12 : vector<24x1xf32> to vector<24x128xf32>
    %15 = arith.addf %13, %14 : vector<24x128xf32>
    %16 = math.tanh %15 : vector<24x128xf32>
    %c2 = arith.constant 2 : index
    %c0_13 = arith.constant 0 : index
    %c0_14 = arith.constant 0 : index
    %17 = vector.load %arg2[%c2, %c0_13, %c0_14] : memref<6x24x24xf32, #tpu.memory_space<vmem>>, vector<1x24x24xf32>
    %18 = vector.shape_cast %17 : vector<1x24x24xf32> to vector<24x24xf32>
    %c2_15 = arith.constant 2 : index
    %c0_16 = arith.constant 0 : index
    %c0_17 = arith.constant 0 : index
    %19 = vector.load %arg3[%c2_15, %c0_16, %c0_17] : memref<6x24x1xf32, #tpu.memory_space<vmem>>, vector<1x24x1xf32>
    %20 = vector.shape_cast %19 : vector<1x24x1xf32> to vector<24x1xf32>
    %cst_18 = arith.constant dense<0.000000e+00> : vector<24x128xf32>
    %21 = tpu.matmul %18, %16, %cst_18 {dimension_numbers = #tpu.dot_dimension_numbers<[1], [0], [0], [1], [0, 0, 1, 1], [], []>} : vector<24x24xf32>, vector<24x128xf32>, vector<24x128xf32> -> vector<24x128xf32>
    %22 = vector.broadcast %20 : vector<24x1xf32> to vector<24x128xf32>
    %23 = arith.addf %21, %22 : vector<24x128xf32>
    %24 = math.tanh %23 : vector<24x128xf32>
    %c3 = arith.constant 3 : index
    %c0_19 = arith.constant 0 : index
    %c0_20 = arith.constant 0 : index
    %25 = vector.load %arg2[%c3, %c0_19, %c0_20] : memref<6x24x24xf32, #tpu.memory_space<vmem>>, vector<1x24x24xf32>
    %26 = vector.shape_cast %25 : vector<1x24x24xf32> to vector<24x24xf32>
    %c3_21 = arith.constant 3 : index
    %c0_22 = arith.constant 0 : index
    %c0_23 = arith.constant 0 : index
    %27 = vector.load %arg3[%c3_21, %c0_22, %c0_23] : memref<6x24x1xf32, #tpu.memory_space<vmem>>, vector<1x24x1xf32>
    %28 = vector.shape_cast %27 : vector<1x24x1xf32> to vector<24x1xf32>
    %cst_24 = arith.constant dense<0.000000e+00> : vector<24x128xf32>
    %29 = tpu.matmul %26, %24, %cst_24 {dimension_numbers = #tpu.dot_dimension_numbers<[1], [0], [0], [1], [0, 0, 1, 1], [], []>} : vector<24x24xf32>, vector<24x128xf32>, vector<24x128xf32> -> vector<24x128xf32>
    %30 = vector.broadcast %28 : vector<24x1xf32> to vector<24x128xf32>
    %31 = arith.addf %29, %30 : vector<24x128xf32>
    %32 = math.tanh %31 : vector<24x128xf32>
    %c4 = arith.constant 4 : index
    %c0_25 = arith.constant 0 : index
    %c0_26 = arith.constant 0 : index
    %33 = vector.load %arg2[%c4, %c0_25, %c0_26] : memref<6x24x24xf32, #tpu.memory_space<vmem>>, vector<1x24x24xf32>
    %34 = vector.shape_cast %33 : vector<1x24x24xf32> to vector<24x24xf32>
    %c4_27 = arith.constant 4 : index
    %c0_28 = arith.constant 0 : index
    %c0_29 = arith.constant 0 : index
    %35 = vector.load %arg3[%c4_27, %c0_28, %c0_29] : memref<6x24x1xf32, #tpu.memory_space<vmem>>, vector<1x24x1xf32>
    %36 = vector.shape_cast %35 : vector<1x24x1xf32> to vector<24x1xf32>
    %cst_30 = arith.constant dense<0.000000e+00> : vector<24x128xf32>
    %37 = tpu.matmul %34, %32, %cst_30 {dimension_numbers = #tpu.dot_dimension_numbers<[1], [0], [0], [1], [0, 0, 1, 1], [], []>} : vector<24x24xf32>, vector<24x128xf32>, vector<24x128xf32> -> vector<24x128xf32>
    %38 = vector.broadcast %36 : vector<24x1xf32> to vector<24x128xf32>
    %39 = arith.addf %37, %38 : vector<24x128xf32>
    %40 = math.tanh %39 : vector<24x128xf32>
    %c5 = arith.constant 5 : index
    %c0_31 = arith.constant 0 : index
    %c0_32 = arith.constant 0 : index
    %41 = vector.load %arg2[%c5, %c0_31, %c0_32] : memref<6x24x24xf32, #tpu.memory_space<vmem>>, vector<1x24x24xf32>
    %42 = vector.shape_cast %41 : vector<1x24x24xf32> to vector<24x24xf32>
    %c5_33 = arith.constant 5 : index
    %c0_34 = arith.constant 0 : index
    %c0_35 = arith.constant 0 : index
    %43 = vector.load %arg3[%c5_33, %c0_34, %c0_35] : memref<6x24x1xf32, #tpu.memory_space<vmem>>, vector<1x24x1xf32>
    %44 = vector.shape_cast %43 : vector<1x24x1xf32> to vector<24x1xf32>
    %cst_36 = arith.constant dense<0.000000e+00> : vector<24x128xf32>
    %45 = tpu.matmul %42, %40, %cst_36 {dimension_numbers = #tpu.dot_dimension_numbers<[1], [0], [0], [1], [0, 0, 1, 1], [], []>} : vector<24x24xf32>, vector<24x128xf32>, vector<24x128xf32> -> vector<24x128xf32>
    %46 = vector.broadcast %44 : vector<24x1xf32> to vector<24x128xf32>
    %47 = arith.addf %45, %46 : vector<24x128xf32>
    %48 = vector.extract_strided_slice %47 {offsets = [0, 0], sizes = [8, 128], strides = [1, 1]} : vector<24x128xf32> to vector<8x128xf32>
    %49 = arith.negf %48 : vector<8x128xf32>
    %50 = math.exp %49 : vector<8x128xf32>
    %cst_37 = arith.constant 1.000000e+00 : f32
    %51 = vector.broadcast %cst_37 : f32 to vector<8x128xf32>
    %52 = arith.addf %51, %50 : vector<8x128xf32>
    %53 = arith.divf %51, %52 : vector<8x128xf32>
    %c0_38 = arith.constant 0 : index
    %c0_39 = arith.constant 0 : index
    %54 = vector.load %arg4[%c0_38, %c0_39] : memref<8x128xf32, #tpu.memory_space<vmem>>, vector<8x128xf32>
    tpu.vector_store %arg4[%c0_38, %c0_39], %53 {strides = array<i32>} : memref<8x128xf32, #tpu.memory_space<vmem>>, vector<8x128xf32>,
    return
  }
  func.func @transform_0(%arg0: i32) -> (i32, i32) {
    %c0_i32 = arith.constant 0 : i32
    %c0_i32_0 = arith.constant 0 : i32
    return %c0_i32, %arg0 : i32, i32
  }
  func.func @transform_1(%arg0: i32) -> (i32, i32, i32) {
    %c0_i32 = arith.constant 0 : i32
    %c0_i32_0 = arith.constant 0 : i32
    %c0_i32_1 = arith.constant 0 : i32
    %c0_i32_2 = arith.constant 0 : i32
    return %c0_i32, %c0_i32_0, %c0_i32_1 : i32, i32, i32
  }
  func.func @transform_2(%arg0: i32) -> (i32, i32, i32) {
    %c0_i32 = arith.constant 0 : i32
    %c0_i32_0 = arith.constant 0 : i32
    %c0_i32_1 = arith.constant 0 : i32
    %c0_i32_2 = arith.constant 0 : i32
    return %c0_i32, %c0_i32_0, %c0_i32_1 : i32, i32, i32
  }
  func.func @transform_3(%arg0: i32) -> (i32, i32) {
    %c0_i32 = arith.constant 0 : i32
    %c0_i32_0 = arith.constant 0 : i32
    return %c0_i32, %arg0 : i32, i32
  }
}

</mosaic_0001>

<bundles_post_ra>
// kernel: tpu_custom_call.1
= control target key start
LH: loop header
LB: loop body
LE: loop exit
PB: predicated region body
PF: predicated region fallthrough
CT: control target
= control target key end

     0   :  { %8 = vsyncpa [#allocation3], 0  ;;  %s1205_s0 = inlined_call_operand.hbm [shape: f32[24,128], index: 0, kind: input, shape index: {}]   ;;  %s1206_s1 = inlined_call_operand.vmem [shape: f32[6,24,24], index: 1, kind: input, shape index: {}]   ;;  %s1207_s2 = inlined_call_operand.vmem [shape: f32[6,24,1], index: 2, kind: input, shape index: {}]   ;;  %s1208_s3 = inlined_call_operand.hbm [shape: f32[8,128], index: 3, kind: output, shape index: {}]  }
   0x1   :  { %9 = vsyncpa [#allocation4], 0  ;;  %s998_s12 = smov [#allocation2]  }
   0x2   :  { %s15_s13 = sshll.u32 %s998_s12, 4  ;;  %s16_s13 = int_to_ptr.vmem [resolvable:$true] %s15_s13 }
   0x3   :  { %s962_s14 = scalar_lea.vmem %s16_s13, 384  ;;  %p967_p1 = scmp.lt.s32.totalorder %s16_s13, %s16_s13 }
   0x4   :  { %p963_p0 = scmp.ne.s32.totalorder %s16_s13, %s962_s14  ;;  %p968_p2 = scmp.lt.s32.totalorder %s962_s14, %s962_s14 }
   0x6   :  { %p969_p3 = por %p968_p2, %p967_p1 }
   0x8   :  { %p970_p4 = pnand %p969_p3, %p963_p0 }
   0xa   :  { %973 = shalt.err (!%p970_p4)
}
   0xb   :  { %s999_s15 = smov 128   ;;  %s1000_s16 = smov 8  }
   0xc   :  { %21 = dma.hbm_to_vmem [thread:$0]  %s1205_s0, 384, %s16_s13, [#allocation3], %s999_s15, %s999_s15, %s1000_s16  }
   0xd   :  { %994 = dma.done.wait [#allocation3], 384  }
   0xe   :  { %995 = vsyncadd [#allocation3], 4294966912  ;;  %v1001_v0 = vmov 0.0   ;;  %vm1002_vm0 = vmmov 0   ;;  %v1003_v1 = vmov 0   ;;  %v31_v2 = vld [vmem:[#allocation2 + $0x10] sm:$0xff] }
   0xf   :  { %821 = vmatprep.subr.mxu0 %v1001_v0  ;;  %827 = vmatprep.mubr.msk.f32.mxu0 %vm1002_vm0, %v1001_v0  ;;  %v30_v3 = vld [vmem:[#allocation2 + $0x8] sm:$0xff]  ;;  %v29_v4 = vld [vmem:[#allocation2] sm:$0xff]  ;;  %v37_v5 = vld [vmem:[%s1207_s2 + $0x10] sm:$0xff]  ;;  %vm53_vm1 = vcmask 195584   ;;  %s1004_s28 = smov [#allocation5]  }
  0x10   :  { %918 = vset.pattern.permute.xlu0 %v1003_v1  ;;  %919 = vset.pattern.permute.xlu1 %v1003_v1  ;;  %v35_v6 = vld [vmem:[%s1207_s2] sm:$0xff]  ;;  %v36_v8 = vld [vmem:[%s1207_s2 + $0x8] sm:$0xff]  ;;  %v742_v12 = vld [vmem:[%s1207_s2 + $0x18] sm:$0xff]  ;;  %s727_s29 = sshll.u32 %s1004_s28, 4  ;;  %s728_s29 = int_to_ptr.vmem [resolvable:$true] %s727_s29 }
  0x11   :  { %836 = vmatprep.subr.mxu1 %v1001_v0  ;;  %842 = vmatprep.mubr.msk.f32.mxu1 %vm1002_vm0, %v1001_v0  ;;  %v32_v7 = vld [vmem:[%s1206_s1] sm:$0xff]  ;;  %v744_v9 = vld [vmem:[%s1207_s2 + $0x28] sm:$0xff]  ;;  %v34_v13 = vld [vmem:[%s1206_s1 + $0x10] sm:$0xff]  ;;  %p979_p6 = scmp.lt.s32.totalorder %s728_s29, %s728_s29 }
  0x12   :  { %822 = vmatpush3.msra.mxu0 %v31_v2  ;;  %50 = vperm.xlu0 %918, %v37_v5   ;;  %v33_v10 = vld [vmem:[%s1206_s1 + $0x8] sm:$0xff]  ;;  %v743_v11 = vld [vmem:[%s1207_s2 + $0x20] sm:$0xff]  ;;  %v752_v15 = vld [vmem:[%s1207_s2 + $0x38] sm:$0xff] }
  0x13   :  { %823 = vmatprep.subr.mxu0 %v1001_v0  ;;  %40 = vperm.xlu1 %919, %v35_v6   ;;  %v753_v14 = vld [vmem:[%s1207_s2 + $0x40] sm:$0xff]  ;;  %v751_v16 = vld [vmem:[%s1207_s2 + $0x30] sm:$0xff]  ;;  %v762_v17 = vld [vmem:[%s1207_s2 + $0x58] sm:$0xff] }
  0x14   :  { %824 = vmatpush3.msra.mxu0 %v30_v3  ;;  %v761_v18 = vld [vmem:[%s1207_s2 + $0x50] sm:$0xff]  ;;  %v760_v19 = vld [vmem:[%s1207_s2 + $0x48] sm:$0xff]  ;;  %v769_v22 = vld [vmem:[%s1207_s2 + $0x60] sm:$0xff] }
  0x15   :  { %825 = vmatprep.subr.mxu0 %v1001_v0  ;;  %v771_v20 = vld [vmem:[%s1207_s2 + $0x70] sm:$0xff]  ;;  %v770_v21 = vld [vmem:[%s1207_s2 + $0x68] sm:$0xff]  ;;  %v778_v23 = vld [vmem:[%s1207_s2 + $0x78] sm:$0xff] }
  0x16   :  { %826 = vmatpush3.msra.mxu0 %v29_v4  ;;  %45 = vperm.xlu0 %918, %v36_v8   ;;  %v739_v38 = vld [vmem:[%s1206_s1 + $0x18] sm:$0xff]  ;;  %v740_v40 = vld [vmem:[%s1206_s1 + $0x20] sm:$0xff]  ;;  %v741_v41 = vld [vmem:[%s1206_s1 + $0x28] sm:$0xff] }
  0x17   :  { %828 = vmatmul.mubr.msk.f32.vlgmr.msra.gmra.mxu0 %vm53_vm1, %v32_v7  ;;  %851 = vmatprep.subr.mxu0 %v1001_v0  ;;  %v748_v56 = vld [vmem:[%s1206_s1 + $0x30] sm:$0xff]  ;;  %v749_v58 = vld [vmem:[%s1206_s1 + $0x38] sm:$0xff]  ;;  %v750_v59 = vld [vmem:[%s1206_s1 + $0x40] sm:$0xff] }
  0x18   :  { %830 = vmatprep.mubr.msk.f32.mxu0 %vm1002_vm0, %v1001_v0  ;;  %166 = vperm.xlu1 %919, %v744_v9  }
  0x1a   :  { %161 = vperm.xlu0 %918, %v743_v11   ;;  %v757_v11 = vld [vmem:[%s1206_s1 + $0x48] sm:$0xff] }
  0x1b   :  { %831 = vmatmul.mubr.msk.f32.gmra.mxu0 %vm53_vm1, %v33_v10 }
  0x1c   :  { %833 = vmatprep.mubr.msk.f32.mxu0 %vm1002_vm0, %v1001_v0  ;;  %156 = vperm.xlu1 %919, %v742_v12  }
  0x1e   :  { %281 = vperm.xlu0 %918, %v753_v14   ;;  %v759_v14 = vld [vmem:[%s1206_s1 + $0x58] sm:$0xff] }
  0x1f   :  { %834 = vmatmul.mubr.msk.f32.gmra.mxu0 %vm53_vm1, %v34_v13  ;;  %v758_v13 = vld [vmem:[%s1206_s1 + $0x50] sm:$0xff] }
  0x20   :  { %857 = vmatprep.mubr.msk.f32.mxu0 %vm1002_vm0, %v1001_v0  ;;  %276 = vperm.xlu1 %919, %v752_v15  }
  0x22   :  { %271 = vperm.xlu0 %918, %v751_v16  }
  0x24   :  { %396 = vperm.xlu1 %919, %v762_v17  }
  0x26   :  { %391 = vperm.xlu0 %918, %v761_v18  }
  0x28   :  { %386 = vperm.xlu1 %919, %v760_v19  }
  0x2a   :  { %511 = vperm.xlu0 %918, %v771_v20  }
  0x2c   :  { %506 = vperm.xlu1 %919, %v770_v21  }
  0x2e   :  { %501 = vperm.xlu0 %918, %v769_v22  }
  0x30   :  { %616 = vperm.xlu1 %919, %v778_v23  }
  0x8d   :  { %v51_v25 = vpop.permute.xlu0 %50 }
  0x8e   :  { %v41_v33 = vpop.permute.xlu1 %40 }
  0x91   :  { %v46_v29 = vpop.permute.xlu0 %45 }
  0x93   :  { %v167_v44 = vpop.permute.xlu1 %166 }
  0x95   :  { %v162_v47 = vpop.permute.xlu0 %161 }
  0x97   :  { %v157_v51 = vpop.permute.xlu1 %156 }
  0x99   :  { %v282_v62 = vpop.permute.xlu0 %281 }
  0x9b   :  { %v277_v2 = vpop.permute.xlu1 %276 }
  0x9d   :  { %v272_v6 = vpop.permute.xlu0 %271 }
  0x9f   :  { %v397_v17 = vpop.permute.xlu1 %396 }
  0xa1   :  { %v392_v20 = vpop.permute.xlu0 %391 }
  0xd7   :  { %v129_v24 = vpop.f32.mrf.mxu0 }
  0xd8   :  { %v130_v35 = vadd.f32 %v129_v24, %v41_v33  ;;  %v387_v24 = vpop.permute.xlu1 %386 }
  0xd9   :  { %v829_v26 = vpop.f32.mrf.mxu0 }
  0xdb   :  { %v134_v27 = vpop.f32.mrf.mxu0 }
  0xdc   :  { %v135_v31 = vadd.f32 %v134_v27, %v46_v29  ;;  %v766_v29 = vld [vmem:[%s1206_s1 + $0x60] sm:$0xff] }
  0xdd   :  { %v832_v28 = vpop.f32.mrf.mxu0 }
  0xdf   :  { %v139_v30 = vpop.f32.mrf.mxu0 }
  0xe0   :  { %v140_v32 = vadd.f32 %v139_v30, %v51_v25 }
  0xe1   :  { %v835_v34 = vpop.f32.mrf.mxu0 }
  0xe2   :  { %920 = vtanh.f32 %v140_v32  ;;  %v768_v32 = vld [vmem:[%s1206_s1 + $0x70] sm:$0xff] }
  0xe3   :  { %922 = vtanh.f32 %v135_v31  ;;  %v767_v31 = vld [vmem:[%s1206_s1 + $0x68] sm:$0xff] }
  0xe4   :  { %924 = vtanh.f32 %v130_v35  ;;  %v512_v35 = vpop.permute.xlu0 %511 }
  0xef   :  { %v921_v36 = vpop.eup %920 }
  0xf0   :  { %837 = vmatpush3.msra.mxu1 %v921_v36  ;;  %v923_v37 = vpop.eup %922 }
  0xf1   :  { %838 = vmatprep.subr.mxu1 %v1001_v0  ;;  %v925_v39 = vpop.eup %924 }
  0xf2   :  { %839 = vmatpush3.msra.mxu1 %v923_v37 }
  0xf3   :  { %840 = vmatprep.subr.mxu1 %v1001_v0 }
  0xf4   :  { %841 = vmatpush3.msra.mxu1 %v925_v39 }
  0xf5   :  { %843 = vmatmul.mubr.msk.f32.vlgmr.msra.gmra.mxu1 %vm53_vm1, %v739_v38  ;;  %866 = vmatprep.subr.mxu1 %v1001_v0  ;;  %v507_v38 = vpop.permute.xlu1 %506 }
  0xf6   :  { %845 = vmatprep.mubr.msk.f32.mxu1 %vm1002_vm0, %v1001_v0 }
  0xf9   :  { %846 = vmatmul.mubr.msk.f32.gmra.mxu1 %vm53_vm1, %v740_v40 }
  0xfa   :  { %848 = vmatprep.mubr.msk.f32.mxu1 %vm1002_vm0, %v1001_v0 }
  0xfd   :  { %849 = vmatmul.mubr.msk.f32.gmra.mxu1 %vm53_vm1, %v741_v41 }
  0xfe   :  { %872 = vmatprep.mubr.msk.f32.mxu1 %vm1002_vm0, %v1001_v0 }
 0x1b5   :  { %v244_v42 = vpop.f32.mrf.mxu1 }
 0x1b6   :  { %v245_v53 = vadd.f32 %v244_v42, %v157_v51  ;;  %v502_v42 = vpop.permute.xlu0 %501  ;;  %v617_v51 = vpop.permute.xlu1 %616 }
 0x1b7   :  { %v844_v43 = vpop.f32.mrf.mxu1 }
 0x1b9   :  { %v249_v45 = vpop.f32.mrf.mxu1 }
 0x1ba   :  { %v250_v49 = vadd.f32 %v249_v45, %v162_v47  ;;  %v775_v47 = vld [vmem:[%s1206_s1 + $0x78] sm:$0xff] }
 0x1bb   :  { %v847_v46 = vpop.f32.mrf.mxu1 }
 0x1bd   :  { %v254_v48 = vpop.f32.mrf.mxu1 }
 0x1be   :  { %v255_v50 = vadd.f32 %v254_v48, %v167_v44 }
 0x1bf   :  { %v850_v52 = vpop.f32.mrf.mxu1 }
 0x1c0   :  { %926 = vtanh.f32 %v255_v50  ;;  %v777_v50 = vld [vmem:[%s1206_s1 + $0x88] sm:$0xff] }
 0x1c1   :  { %928 = vtanh.f32 %v250_v49  ;;  %v776_v49 = vld [vmem:[%s1206_s1 + $0x80] sm:$0xff]  ;;  %s974_s1 = scalar_lea.vmem %s728_s29, 128 }
 0x1c2   :  { %930 = vtanh.f32 %v245_v53  ;;  %p975_p5 = scmp.ne.s32.totalorder %s728_s29, %s974_s1  ;;  %p980_p7 = scmp.lt.s32.totalorder %s974_s1, %s974_s1 }
 0x1c4   :  { %p981_p8 = por %p980_p7, %p979_p6 }
 0x1c6   :  { %p982_p9 = pnand %p981_p8, %p975_p5 }
 0x1cd   :  { %v927_v54 = vpop.eup %926 }
 0x1ce   :  { %852 = vmatpush3.msra.mxu0 %v927_v54  ;;  %v929_v55 = vpop.eup %928 }
 0x1cf   :  { %853 = vmatprep.subr.mxu0 %v1001_v0  ;;  %v931_v57 = vpop.eup %930 }
 0x1d0   :  { %854 = vmatpush3.msra.mxu0 %v929_v55 }
 0x1d1   :  { %855 = vmatprep.subr.mxu0 %v1001_v0 }
 0x1d2   :  { %856 = vmatpush3.msra.mxu0 %v931_v57 }
 0x1d3   :  { %858 = vmatmul.mubr.msk.f32.vlgmr.msra.gmra.mxu0 %vm53_vm1, %v748_v56  ;;  %881 = vmatprep.subr.mxu0 %v1001_v0 }
 0x1d4   :  { %860 = vmatprep.mubr.msk.f32.mxu0 %vm1002_vm0, %v1001_v0 }
 0x1d7   :  { %861 = vmatmul.mubr.msk.f32.gmra.mxu0 %vm53_vm1, %v749_v58 }
 0x1d8   :  { %863 = vmatprep.mubr.msk.f32.mxu0 %vm1002_vm0, %v1001_v0 }
 0x1db   :  { %864 = vmatmul.mubr.msk.f32.gmra.mxu0 %vm53_vm1, %v750_v59 }
 0x1dc   :  { %887 = vmatprep.mubr.msk.f32.mxu0 %vm1002_vm0, %v1001_v0 }
 0x293   :  { %v359_v60 = vpop.f32.mrf.mxu0 }
 0x294   :  { %v360_v8 = vadd.f32 %v359_v60, %v272_v6 }
 0x295   :  { %v859_v61 = vpop.f32.mrf.mxu0 }
 0x297   :  { %v364_v63 = vpop.f32.mrf.mxu0 }
 0x298   :  { %v365_v4 = vadd.f32 %v364_v63, %v277_v2 }
 0x299   :  { %v862_v1 = vpop.f32.mrf.mxu0 }
 0x29b   :  { %v369_v3 = vpop.f32.mrf.mxu0 }
 0x29c   :  { %v370_v5 = vadd.f32 %v369_v3, %v282_v62 }
 0x29d   :  { %v865_v7 = vpop.f32.mrf.mxu0 }
 0x29e   :  { %932 = vtanh.f32 %v370_v5 }
 0x29f   :  { %934 = vtanh.f32 %v365_v4 }
 0x2a0   :  { %936 = vtanh.f32 %v360_v8 }
 0x2ab   :  { %v933_v9 = vpop.eup %932 }
 0x2ac   :  { %867 = vmatpush3.msra.mxu1 %v933_v9  ;;  %v935_v10 = vpop.eup %934 }
 0x2ad   :  { %868 = vmatprep.subr.mxu1 %v1001_v0  ;;  %v937_v12 = vpop.eup %936 }
 0x2ae   :  { %869 = vmatpush3.msra.mxu1 %v935_v10 }
 0x2af   :  { %870 = vmatprep.subr.mxu1 %v1001_v0 }
 0x2b0   :  { %871 = vmatpush3.msra.mxu1 %v937_v12 }
 0x2b1   :  { %873 = vmatmul.mubr.msk.f32.vlgmr.msra.gmra.mxu1 %vm53_vm1, %v757_v11  ;;  %896 = vmatprep.subr.mxu1 %v1001_v0 }
 0x2b2   :  { %875 = vmatprep.mubr.msk.f32.mxu1 %vm1002_vm0, %v1001_v0 }
 0x2b5   :  { %876 = vmatmul.mubr.msk.f32.gmra.mxu1 %vm53_vm1, %v758_v13 }
 0x2b6   :  { %878 = vmatprep.mubr.msk.f32.mxu1 %vm1002_vm0, %v1001_v0 }
 0x2b9   :  { %879 = vmatmul.mubr.msk.f32.gmra.mxu1 %vm53_vm1, %v759_v14 }
 0x2ba   :  { %902 = vmatprep.mubr.msk.f32.mxu1 %vm1002_vm0, %v1001_v0 }
 0x371   :  { %v474_v15 = vpop.f32.mrf.mxu1 }
 0x372   :  { %v475_v26 = vadd.f32 %v474_v15, %v387_v24 }
 0x373   :  { %v874_v16 = vpop.f32.mrf.mxu1 }
 0x375   :  { %v479_v18 = vpop.f32.mrf.mxu1 }
 0x376   :  { %v480_v22 = vadd.f32 %v479_v18, %v392_v20 }
 0x377   :  { %v877_v19 = vpop.f32.mrf.mxu1 }
 0x379   :  { %v484_v21 = vpop.f32.mrf.mxu1 }
 0x37a   :  { %v485_v23 = vadd.f32 %v484_v21, %v397_v17 }
 0x37b   :  { %v880_v25 = vpop.f32.mrf.mxu1 }
 0x37c   :  { %938 = vtanh.f32 %v485_v23 }
 0x37d   :  { %940 = vtanh.f32 %v480_v22 }
 0x37e   :  { %942 = vtanh.f32 %v475_v26 }
 0x389   :  { %v939_v27 = vpop.eup %938 }
 0x38a   :  { %882 = vmatpush3.msra.mxu0 %v939_v27  ;;  %v941_v28 = vpop.eup %940 }
 0x38b   :  { %883 = vmatprep.subr.mxu0 %v1001_v0  ;;  %v943_v30 = vpop.eup %942 }
 0x38c   :  { %884 = vmatpush3.msra.mxu0 %v941_v28 }
 0x38d   :  { %885 = vmatprep.subr.mxu0 %v1001_v0 }
 0x38e   :  { %886 = vmatpush3.msra.mxu0 %v943_v30 }
 0x38f   :  { %888 = vmatmul.mubr.msk.f32.vlgmr.msra.gmra.mxu0 %vm53_vm1, %v766_v29 }
 0x390   :  { %890 = vmatprep.mubr.msk.f32.mxu0 %vm1002_vm0, %v1001_v0 }
 0x393   :  { %891 = vmatmul.mubr.msk.f32.gmra.mxu0 %vm53_vm1, %v767_v31 }
 0x394   :  { %893 = vmatprep.mubr.msk.f32.mxu0 %vm1002_vm0, %v1001_v0 }
 0x397   :  { %894 = vmatmul.mubr.msk.f32.gmra.mxu0 %vm53_vm1, %v768_v32 }
 0x44f   :  { %v589_v33 = vpop.f32.mrf.mxu0 }
 0x450   :  { %v590_v44 = vadd.f32 %v589_v33, %v502_v42 }
 0x451   :  { %v889_v34 = vpop.f32.mrf.mxu0 }
 0x453   :  { %v594_v36 = vpop.f32.mrf.mxu0 }
 0x454   :  { %v595_v40 = vadd.f32 %v594_v36, %v507_v38 }
 0x455   :  { %v892_v37 = vpop.f32.mrf.mxu0 }
 0x457   :  { %v599_v39 = vpop.f32.mrf.mxu0 }
 0x458   :  { %v600_v41 = vadd.f32 %v599_v39, %v512_v35 }
 0x459   :  { %v895_v43 = vpop.f32.mrf.mxu0 }
 0x45a   :  { %944 = vtanh.f32 %v600_v41 }
 0x45b   :  { %946 = vtanh.f32 %v595_v40 }
 0x45c   :  { %948 = vtanh.f32 %v590_v44 }
 0x467   :  { %v945_v45 = vpop.eup %944 }
 0x468   :  { %897 = vmatpush3.msra.mxu1 %v945_v45  ;;  %v947_v46 = vpop.eup %946 }
 0x469   :  { %898 = vmatprep.subr.mxu1 %v1001_v0  ;;  %v949_v48 = vpop.eup %948 }
 0x46a   :  { %899 = vmatpush3.msra.mxu1 %v947_v46 }
 0x46b   :  { %900 = vmatprep.subr.mxu1 %v1001_v0 }
 0x46c   :  { %901 = vmatpush3.msra.mxu1 %v949_v48 }
 0x46d   :  { %903 = vmatmul.mubr.msk.f32.vlgmr.msra.gmra.mxu1 %vm53_vm1, %v775_v47 }
 0x46e   :  { %905 = vmatprep.mubr.msk.f32.mxu1 %vm1002_vm0, %v1001_v0 }
 0x471   :  { %906 = vmatmul.mubr.msk.f32.gmra.mxu1 %vm53_vm1, %v776_v49 }
 0x472   :  { %908 = vmatprep.mubr.msk.f32.mxu1 %vm1002_vm0, %v1001_v0 }
 0x475   :  { %909 = vmatmul.mubr.msk.f32.gmra.mxu1 %vm53_vm1, %v777_v50 }
 0x52d   :  { %v702_v52 = vpop.f32.mrf.mxu1 }
 0x52e   :  { %v703_v53 = vadd.f32 %v702_v52, %v617_v51 }
 0x52f   :  { %v904_v54 = vpop.f32.mrf.mxu1 }
 0x530   :  { %v784_v55 = vmul.f32 -1.442695, %v703_v53 }
 0x531   :  { %v707_v56 = vpop.f32.mrf.mxu1 }
 0x532   :  { %950 = vpow2.f32 %v784_v55 }
 0x533   :  { %v907_v57 = vpop.f32.mrf.mxu1 }
 0x535   :  { %v711_v58 = vpop.f32.mrf.mxu1 }
 0x537   :  { %v910_v59 = vpop.f32.mrf.mxu1 }
 0x53f   :  { %v951_v60 = vpop.eup %950 }
 0x540   :  { %v717_v61 = vadd.f32 1.0, %v951_v60 }
 0x542   :  { %952 = vrcp.f32 %v717_v61 }
 0x54f   :  { %v953_v0 = vpop.eup %952 }
 0x550   :  { %720 = vst [vmem:[#allocation5] sm:$0xff] %v953_v0 }
 0x551   :  { %985 = shalt.err (!%p982_p9)
}
 0x552   :  { %730 = dma.vmem_to_hbm [thread:$0]  %s728_s29, 128, %s1208_s3, [#allocation4]  }
 0x553   :  { %996 = dma.done.wait [#allocation4], 128  }
 0x554   :  { %997 = vsyncadd [#allocation4], 4294967168 }
 0x555   :  { %734 = vsyncpa [#allocation3], 1 }
 0x556   :  { %735 = vsyncpa [#allocation4], 1 }

</bundles_post_ra>
